<compile_context>
chip_gen: v7x
topology: tpu7x:2x2x1
jax: 0.10.0
libtpu: 0.0.40
codegen_flags: <defaults>
</compile_context>

<pallas_src>
import functools

import jax
import jax.numpy as jnp
import numpy as np
from jax.experimental import pallas as pl
from jax.experimental.pallas import tpu as pltpu

HIDDEN = 128


def qnet_kernel(x_ref, w1_ref, b1_ref, w2_ref, b2_ref, w3_ref, b3_ref, o_ref):
    # Fused forward pass on one batch tile.  Matmuls accumulate in f32 on the
    # MXU; bias adds / ReLU stay f32 on the VPU (safe on v5e, free filler slots).
    # x is cast to the MXU dtype here (in-VMEM VPU cast, no extra HBM pass).
    x = x_ref[...].astype(w1_ref.dtype)
    h1 = jnp.dot(x, w1_ref[...], preferred_element_type=jnp.float32) + b1_ref[...]
    h1 = jnp.maximum(h1, 0.0).astype(w2_ref.dtype)   # narrow only the MXU operand
    h2 = jnp.dot(h1, w2_ref[...], preferred_element_type=jnp.float32) + b2_ref[...]
    h2 = jnp.maximum(h2, 0.0).astype(w3_ref.dtype)
    out = jnp.dot(h2, w3_ref[...], preferred_element_type=jnp.float32) + b3_ref[...]
    # o_ref is either the full lane-dense 128-wide slab (unmasked vst) or the
    # narrow action_dim slab (masked store, ~32x less HBM writeback).
    o_ref[...] = out[:, : o_ref.shape[-1]].astype(o_ref.dtype)


def prepare_params(params, mxu_dtype=jnp.float32):
    """One-time weight prep: cast weights to the MXU dtype, keep biases f32,
    pad the final layer's output dim to a lane-dense multiple of 128.

    Call once when params change; reuse the result across forward calls so the
    pad/convert ops do not run on every inference.
    Returns (prepped_dict, action_dim)."""
    action_dim = params["w3"].shape[1]
    out_pad = max(128, pl.cdiv(action_dim, 128) * 128)

    w1 = params["w1"].astype(mxu_dtype)
    w2 = params["w2"].astype(mxu_dtype)
    w3p = (
        jnp.zeros((HIDDEN, out_pad), mxu_dtype)
        .at[:, :action_dim]
        .set(params["w3"].astype(mxu_dtype))
    )
    b1 = params["b1"].reshape(1, HIDDEN).astype(jnp.float32)
    b2 = params["b2"].reshape(1, HIDDEN).astype(jnp.float32)
    b3p = (
        jnp.zeros((1, out_pad), jnp.float32)
        .at[:, :action_dim]
        .set(params["b3"].astype(jnp.float32))
    )
    prepped = {"w1": w1, "b1": b1, "w2": w2, "b2": b2, "w3": w3p, "b3": b3p}
    return prepped, action_dim


def _cost_estimate(rows, input_dim, out_pad, out_cols, x_size, mxu_size, out_size):
    flops = 2 * rows * (input_dim * HIDDEN + HIDDEN * HIDDEN + HIDDEN * out_pad)
    w_bytes = (
        (input_dim * HIDDEN + HIDDEN * HIDDEN + HIDDEN * out_pad) * mxu_size
        + (2 * HIDDEN + out_pad) * 4
    )
    return pl.CostEstimate(
        flops=flops,
        transcendentals=0,
        bytes_accessed=rows * input_dim * x_size + w_bytes + rows * out_cols * out_size,
    )


@functools.partial(
    jax.jit,
    static_argnames=("action_dim", "tile_b", "narrow_output", "core_parallel"),
)
def qnetwork_forward(x, prepped, action_dim, *, tile_b=2048,
                     narrow_output=False, core_parallel=False):
    """x: (B, input_dim), any float dtype (cast to the MXU dtype in-kernel).

    prepped:       output dict of prepare_params() (cast + padded weights).
    action_dim:    static number of valid output columns.
    tile_b:        batch tile for the pipelined path (multiple of 8).  2048 keeps
                   double-buffered x/out ~4 MiB -> fits v5e's 16 MiB default
                   scoped VMEM; up to ~4096 is safe on every generation.
    narrow_output: kernel writes only action_dim columns (masked store,
                   ~32x less HBM writeback) instead of the lane-dense 128 slab.
    core_parallel: set True on v7x to shard batch tiles across its 2 TensorCores.
    """
    B, input_dim = x.shape
    w1, b1, w2, b2, w3p, b3p = (prepped[k] for k in ("w1", "b1", "w2", "b2", "w3", "b3"))
    mxu_dtype = w1.dtype
    out_pad = w3p.shape[1]
    # bf16 MXU path also writes a bf16 slab (halves writeback); the wrapper casts
    # only the tiny (B, action_dim) slice back to f32 for module parity.
    out_dtype = jnp.bfloat16 if mxu_dtype == jnp.bfloat16 else jnp.float32
    x_size = jnp.dtype(x.dtype).itemsize
    mxu_size = jnp.dtype(mxu_dtype).itemsize
    out_size = jnp.dtype(out_dtype).itemsize

    if B <= tile_b:
        # ---- Small-batch path: no grid, whole arrays resident in VMEM. ----
        cost = _cost_estimate(B, input_dim, out_pad, out_pad, x_size, mxu_size, out_size)
        out = pl.pallas_call(
            qnet_kernel,
            out_shape=jax.ShapeDtypeStruct((B, out_pad), out_dtype),
            in_specs=[pl.BlockSpec(memory_space=pltpu.MemorySpace.VMEM)] * 7,
            out_specs=pl.BlockSpec(memory_space=pltpu.MemorySpace.VMEM),
            cost_estimate=cost,
        )(x, w1, b1, w2, b2, w3p, b3p)
        return out[:, :action_dim].astype(jnp.float32)

    # ---- Batched path: tile the batch, weights resident, x/out pipelined. ----
    num_tiles = pl.cdiv(B, tile_b)
    b_pad = num_tiles * tile_b
    if b_pad != B:
        # TODO(synk): a ragged-last-tile row mask would avoid this copy of x.
        x = jnp.pad(x, ((0, b_pad - B), (0, 0)))

    out_cols = action_dim if narrow_output else out_pad
    cost = _cost_estimate(b_pad, input_dim, out_pad, out_cols, x_size, mxu_size, out_size)
    semantics = (pltpu.CORE_PARALLEL,) if core_parallel else ("parallel",)

    grid_spec = pltpu.PrefetchScalarGridSpec(
        num_scalar_prefetch=0,
        grid=(num_tiles,),
        in_specs=[
            pl.BlockSpec((tile_b, input_dim), lambda i: (i, 0)),   # x: streamed
            # Weights/biases: constant index_map -> fetched once, resident in VMEM.
            # (pl.Buffered(1) on these would save ~130 KiB of redundant buffers;
            #  skipped as the saving is negligible at this footprint.)
            pl.BlockSpec((input_dim, HIDDEN), lambda i: (0, 0)),   # w1
            pl.BlockSpec((1, HIDDEN), lambda i: (0, 0)),           # b1
            pl.BlockSpec((HIDDEN, HIDDEN), lambda i: (0, 0)),      # w2
            pl.BlockSpec((1, HIDDEN), lambda i: (0, 0)),           # b2
            pl.BlockSpec((HIDDEN, out_pad), lambda i: (0, 0)),     # w3 (padded)
            pl.BlockSpec((1, out_pad), lambda i: (0, 0)),          # b3 (padded)
        ],
        out_specs=pl.BlockSpec((tile_b, out_cols), lambda i: (i, 0)),
    )

    out = pl.pallas_call(
        qnet_kernel,
        out_shape=jax.ShapeDtypeStruct((b_pad, out_cols), out_dtype),
        grid_spec=grid_spec,
        compiler_params=pltpu.CompilerParams(dimension_semantics=semantics),
        cost_estimate=cost,
    )(x, w1, b1, w2, b2, w3p, b3p)
    return out[:B, :action_dim].astype(jnp.float32)


def init_params(key, input_dim, action_dim):
    """PyTorch-Linear-style init (uniform +/- 1/sqrt(fan_in)); weights as (in, out)."""
    keys = jax.random.split(key, 6)

    def linear(kw, kb, fan_in, fan_out):
        bound = 1.0 / np.sqrt(fan_in)
        w = jax.random.uniform(kw, (fan_in, fan_out), jnp.float32, -bound, bound)
        b = jax.random.uniform(kb, (fan_out,), jnp.float32, -bound, bound)
        return w, b

    w1, b1 = linear(keys[0], keys[1], input_dim, HIDDEN)
    w2, b2 = linear(keys[2], keys[3], HIDDEN, HIDDEN)
    w3, b3 = linear(keys[4], keys[5], HIDDEN, action_dim)
    return {"w1": w1, "b1": b1, "w2": w2, "b2": b2, "w3": w3, "b3": b3}


def reference_forward(x, p):
    h1 = jnp.maximum(x @ p["w1"] + p["b1"], 0.0)
    h2 = jnp.maximum(h1 @ p["w2"] + p["b2"], 0.0)
    return h2 @ p["w3"] + p["b3"]


if __name__ == "__main__":
    key = jax.random.PRNGKey(0)
    k_param, k_x1, k_x2 = jax.random.split(key, 3)

    input_dim = 8      # small state vector
    action_dim = 4     # discrete actions
    params = init_params(k_param, input_dim, action_dim)

    # One-time weight prep (hoisted out of the per-call path).
    prep_f32, adim = prepare_params(params, jnp.float32)
    prep_bf16, _ = prepare_params(params, jnp.bfloat16)

    # 1) Small batch -> whole-array VMEM path (exact f32 check).
    x_small = jax.random.normal(k_x1, (2, input_dim), jnp.float32)
    out_small = jax.block_until_ready(qnetwork_forward(x_small, prep_f32, action_dim=adim))
    ref_small = reference_forward(x_small, params)
    np.testing.assert_allclose(np.asarray(out_small), np.asarray(ref_small),
                               rtol=1e-5, atol=1e-5)

    # 2) Larger, non-multiple-of-tile batch -> batch-tiled pipelined path (f32).
    #    (tile_b=256 here only to exercise the grid path at small test shapes;
    #     the production default is 2048.)
    x_big = jax.random.normal(k_x2, (1000, input_dim), jnp.float32)
    out_big = jax.block_until_ready(
        qnetwork_forward(x_big, prep_f32, action_dim=adim, tile_b=256))
    ref_big = reference_forward(x_big, params)
    np.testing.assert_allclose(np.asarray(out_big), np.asarray(ref_big),
                               rtol=1e-5, atol=1e-5)

    # 3) bf16 MXU operands + bf16 output slab (f32 accumulation), loose tol.
    out_bf16 = jax.block_until_ready(
        qnetwork_forward(x_big, prep_bf16, action_dim=adim, tile_b=256))
    np.testing.assert_allclose(np.asarray(out_bf16), np.asarray(ref_big),
                               rtol=2e-2, atol=2e-2)

    # 4) Narrow-output variant (masked store, minimal HBM writeback).
    out_narrow = jax.block_until_ready(
        qnetwork_forward(x_big, prep_bf16, action_dim=adim, tile_b=256,
                         narrow_output=True))
    np.testing.assert_allclose(np.asarray(out_narrow), np.asarray(ref_big),
                               rtol=2e-2, atol=2e-2)

    print("KERNEL_OK")
</pallas_src>

<mosaic_0001>
module attributes {stable_mosaic.version = 11 : i64} {
  func.func @qnet_kernel(%arg0: memref<2x8xf32, #tpu.memory_space<vmem>>, %arg1: memref<8x128xf32, #tpu.memory_space<vmem>>, %arg2: memref<1x128xf32, #tpu.memory_space<vmem>>, %arg3: memref<128x128xf32, #tpu.memory_space<vmem>>, %arg4: memref<1x128xf32, #tpu.memory_space<vmem>>, %arg5: memref<128x128xf32, #tpu.memory_space<vmem>>, %arg6: memref<1x128xf32, #tpu.memory_space<vmem>>, %arg7: memref<2x128xf32, #tpu.memory_space<vmem>>) attributes {dimension_semantics = [], scalar_prefetch = 0 : i64, scratch_operands = 0 : i64, tpu.core_type = #tpu.core_type<tc>} {
    %c0 = arith.constant 0 : index
    %c0_0 = arith.constant 0 : index
    %0 = vector.load %arg0[%c0, %c0_0] : memref<2x8xf32, #tpu.memory_space<vmem>>, vector<2x8xf32>
    %c0_1 = arith.constant 0 : index
    %c0_2 = arith.constant 0 : index
    %1 = vector.load %arg1[%c0_1, %c0_2] : memref<8x128xf32, #tpu.memory_space<vmem>>, vector<8x128xf32>
    %cst = arith.constant dense<0.000000e+00> : vector<2x128xf32>
    %2 = tpu.matmul %0, %1, %cst {dimension_numbers = #tpu.dot_dimension_numbers<[1], [0], [0], [1], [0, 0, 1, 1], [], []>} : vector<2x8xf32>, vector<8x128xf32>, vector<2x128xf32> -> vector<2x128xf32>
    %c0_3 = arith.constant 0 : index
    %c0_4 = arith.constant 0 : index
    %3 = vector.load %arg2[%c0_3, %c0_4] : memref<1x128xf32, #tpu.memory_space<vmem>>, vector<1x128xf32>
    %4 = vector.broadcast %3 : vector<1x128xf32> to vector<2x128xf32>
    %5 = arith.addf %2, %4 : vector<2x128xf32>
    %cst_5 = arith.constant 0.000000e+00 : f32
    %6 = vector.broadcast %cst_5 : f32 to vector<2x128xf32>
    %7 = arith.maximumf %5, %6 : vector<2x128xf32>
    %c0_6 = arith.constant 0 : index
    %c0_7 = arith.constant 0 : index
    %8 = vector.load %arg3[%c0_6, %c0_7] : memref<128x128xf32, #tpu.memory_space<vmem>>, vector<128x128xf32>
    %cst_8 = arith.constant dense<0.000000e+00> : vector<2x128xf32>
    %9 = tpu.matmul %7, %8, %cst_8 {dimension_numbers = #tpu.dot_dimension_numbers<[1], [0], [0], [1], [0, 0, 1, 1], [], []>} : vector<2x128xf32>, vector<128x128xf32>, vector<2x128xf32> -> vector<2x128xf32>
    %c0_9 = arith.constant 0 : index
    %c0_10 = arith.constant 0 : index
    %10 = vector.load %arg4[%c0_9, %c0_10] : memref<1x128xf32, #tpu.memory_space<vmem>>, vector<1x128xf32>
    %11 = vector.broadcast %10 : vector<1x128xf32> to vector<2x128xf32>
    %12 = arith.addf %9, %11 : vector<2x128xf32>
    %cst_11 = arith.constant 0.000000e+00 : f32
    %13 = vector.broadcast %cst_11 : f32 to vector<2x128xf32>
    %14 = arith.maximumf %12, %13 : vector<2x128xf32>
    %c0_12 = arith.constant 0 : index
    %c0_13 = arith.constant 0 : index
    %15 = vector.load %arg5[%c0_12, %c0_13] : memref<128x128xf32, #tpu.memory_space<vmem>>, vector<128x128xf32>
    %cst_14 = arith.constant dense<0.000000e+00> : vector<2x128xf32>
    %16 = tpu.matmul %14, %15, %cst_14 {dimension_numbers = #tpu.dot_dimension_numbers<[1], [0], [0], [1], [0, 0, 1, 1], [], []>} : vector<2x128xf32>, vector<128x128xf32>, vector<2x128xf32> -> vector<2x128xf32>
    %c0_15 = arith.constant 0 : index
    %c0_16 = arith.constant 0 : index
    %17 = vector.load %arg6[%c0_15, %c0_16] : memref<1x128xf32, #tpu.memory_space<vmem>>, vector<1x128xf32>
    %18 = vector.broadcast %17 : vector<1x128xf32> to vector<2x128xf32>
    %19 = arith.addf %16, %18 : vector<2x128xf32>
    %c0_17 = arith.constant 0 : index
    %c0_18 = arith.constant 0 : index
    %20 = vector.load %arg7[%c0_17, %c0_18] : memref<2x128xf32, #tpu.memory_space<vmem>>, vector<2x128xf32>
    tpu.vector_store %arg7[%c0_17, %c0_18], %19 {strides = array<i32>} : memref<2x128xf32, #tpu.memory_space<vmem>>, vector<2x128xf32>,
    return
  }
}

</mosaic_0001>

<bundles_post_ra>
// kernel: qnetwork_forward.1
= control target key start
LH: loop header
LB: loop body
LE: loop exit
PB: predicated region body
PF: predicated region fallthrough
CT: control target
= control target key end

     0   :  { %12 = vsyncpa [#allocation3], 0  ;;  %s754_s0 = inlined_call_operand.hbm [shape: f32[2,8], index: 0, kind: input, shape index: {}]   ;;  %s755_s1 = inlined_call_operand.vmem [shape: f32[8,128], index: 1, kind: input, shape index: {}]   ;;  %s756_s2 = inlined_call_operand.vmem [shape: f32[1,128], index: 2, kind: input, shape index: {}]   ;;  %s757_s3 = inlined_call_operand.hbm [shape: f32[128,128], index: 3, kind: input, shape index: {}]   ;;  %s758_s4 = inlined_call_operand.vmem [shape: f32[1,128], index: 4, kind: input, shape index: {}]   ;;  %s759_s5 = inlined_call_operand.hbm [shape: f32[128,128], index: 5, kind: input, shape index: {}]   ;;  %s760_s6 = inlined_call_operand.vmem [shape: f32[1,128], index: 6, kind: input, shape index: {}]   ;;  %s761_s7 = inlined_call_operand.hbm [shape: f32[2,128], index: 7, kind: output, shape index: {}]  }
   0x1   :  { %13 = vsyncpa [#allocation6], 0 }
   0x2   :  { %14 = vsyncpa [#allocation4], 0  ;;  %s620_s24 = smov [#allocation5]   ;;  %s526_s28 = scalar_lea.hbm %s757_s3, 2048 }
   0x3   :  { %s34_s25 = sshll.u32 %s620_s24, 4  ;;  %p527_p0 = scmp.ne.s32.totalorder %s757_s3, %s526_s28  ;;  %s35_s25 = int_to_ptr.vmem [resolvable:$true] %s34_s25 }
   0x4   :  { %p530_p1 = scmp.lt.u32.totalorder %s526_s28, %s757_s3 }
   0x6   :  { %p532_p2 = pnand %p530_p1, %p527_p0 }
   0x8   :  { %535 = shalt.err (!%p532_p2)
}
   0x9   :  { %s536_s10 = scalar_lea.vmem %s35_s25, 2048  ;;  %p541_p4 = scmp.lt.s32.totalorder %s35_s25, %s35_s25 }
   0xa   :  { %p537_p3 = scmp.ne.s32.totalorder %s35_s25, %s536_s10  ;;  %p542_p5 = scmp.lt.s32.totalorder %s536_s10, %s536_s10 }
   0xc   :  { %p543_p6 = por %p542_p5, %p541_p4 }
   0xe   :  { %p544_p7 = pnand %p543_p6, %p537_p3 }
  0x10   :  { %547 = shalt.err (!%p544_p7)
}
  0x11   :  { %s621_s11 = smov 128   ;;  %s622_s12 = smov 8  }
  0x12   :  { %40 = dma.hbm_to_vmem [thread:$0]  %s757_s3, 2048, %s35_s25, [#allocation6], %s621_s11, %s621_s11, %s622_s12  }
  0x13   :  { %s623_s15 = smov [#allocation2]   ;;  %s624_s17 = smov [#allocation7]  }
  0x14   :  { %s21_s16 = sshll.u32 %s623_s15, 4  ;;  %s48_s18 = sshll.u32 %s624_s17, 4  ;;  %s22_s16 = int_to_ptr.vmem [resolvable:$true] %s21_s16  ;;  %s49_s18 = int_to_ptr.vmem [resolvable:$true] %s48_s18 }
  0x15   :  { %s548_s21 = scalar_lea.hbm %s754_s0, 32 }
  0x16   :  { %p549_p8 = scmp.ne.s32.totalorder %s754_s0, %s548_s21  ;;  %p552_p9 = scmp.lt.u32.totalorder %s548_s21, %s754_s0 }
  0x18   :  { %p554_p10 = pnand %p552_p9, %p549_p8 }
  0x1a   :  { %557 = shalt.err (!%p554_p10)
}
  0x1b   :  { %s558_s3 = scalar_lea.vmem %s22_s16, 32  ;;  %p563_p12 = scmp.lt.s32.totalorder %s22_s16, %s22_s16 }
  0x1c   :  { %p559_p11 = scmp.ne.s32.totalorder %s22_s16, %s558_s3  ;;  %p564_p13 = scmp.lt.s32.totalorder %s558_s3, %s558_s3 }
  0x1e   :  { %p565_p0 = por %p564_p13, %p563_p12 }
  0x20   :  { %p566_p1 = pnand %p565_p0, %p559_p11 }
  0x22   :  { %569 = shalt.err (!%p566_p1)
}
  0x23   :  { %24 = dma.hbm_to_vmem [thread:$0]  %s754_s0, 32, %s22_s16, [#allocation3]  }
  0x24   :  { %s570_s30 = scalar_lea.hbm %s759_s5, 2048 }
  0x25   :  { %p571_p2 = scmp.ne.s32.totalorder %s759_s5, %s570_s30  ;;  %p574_p3 = scmp.lt.u32.totalorder %s570_s30, %s759_s5 }
  0x27   :  { %p576_p4 = pnand %p574_p3, %p571_p2 }
  0x29   :  { %579 = shalt.err (!%p576_p4)
}
  0x2a   :  { %s580_s14 = scalar_lea.vmem %s49_s18, 2048  ;;  %p585_p6 = scmp.lt.s32.totalorder %s49_s18, %s49_s18 }
  0x2b   :  { %p581_p5 = scmp.ne.s32.totalorder %s49_s18, %s580_s14  ;;  %p586_p7 = scmp.lt.s32.totalorder %s580_s14, %s580_s14 }
  0x2d   :  { %p587_p8 = por %p586_p7, %p585_p6 }
  0x2f   :  { %p588_p9 = pnand %p587_p8, %p581_p5 }
  0x31   :  { %591 = shalt.err (!%p588_p9)
}
  0x32   :  { %54 = dma.hbm_to_vmem [thread:$0]  %s759_s5, 2048, %s49_s18, [#allocation6], %s621_s11, %s621_s11, %s622_s12  }
  0x33   :  { %614 = dma.done.wait [#allocation3], 32  }
  0x34   :  { %615 = vsyncadd [#allocation3], 4294967264 }
  0x35   :  { %616 = dma.done.wait [#allocation6], 4096  }
  0x36   :  { %617 = vsyncadd [#allocation6], 4294963200  ;;  %v625_v0 = vmov 0.0   ;;  %vm626_vm0 = vmmov 0   ;;  %v627_v1 = vmov 0.0|0.0   ;;  %vm75_vm1 = vcmask 64512  }
  0x37   :  { %394 = vmatprep.subr.mxu0 %v625_v0  ;;  %396 = vmatprep.mubr.msk.f32.mxu0 %vm626_vm0, %v625_v0  ;;  %v67_v2 = vld [vmem:[%s755_s1] sm:$0xff]  ;;  %v66_v3 = vld [vmem:[#allocation2] sm:$0x3]  ;;  %v150_v4 = vld [vmem:[#allocation5] sm:$0xff]  ;;  %s628_s19 = smov [#allocation8]  }
  0x38   :  { %469 = vmatprep.subr.bf16.mxu1 %v627_v1  ;;  %431 = vmatprep.mubr.msk.f32.mxu1 %vm626_vm0, %v625_v0  ;;  %v151_v5 = vld [vmem:[#allocation5 + $0x8] sm:$0xff]  ;;  %v152_v6 = vld [vmem:[#allocation5 + $0x10] sm:$0xff]  ;;  %v153_v7 = vld [vmem:[#allocation5 + $0x18] sm:$0xff]  ;;  %s344_s20 = sshll.u32 %s628_s19, 4  ;;  %s345_s20 = int_to_ptr.vmem [resolvable:$true] %s344_s20 }
  0x39   :  { %395 = vmatpush3.msra.mxu0 %v67_v2  ;;  %v470_v8 = vpack.c.bf16 %v151_v5, %v150_v4  ;;  %v473_v9 = vpack.c.bf16 %v153_v7, %v152_v6  ;;  %v154_v10 = vld [vmem:[#allocation5 + $0x20] sm:$0xff]  ;;  %v155_v11 = vld [vmem:[#allocation5 + $0x28] sm:$0xff]  ;;  %v156_v13 = vld [vmem:[#allocation5 + $0x30] sm:$0xff]  ;;  %s592_s21 = scalar_lea.vmem %s345_s20, 32  ;;  %p597_p11 = scmp.lt.s32.totalorder %s345_s20, %s345_s20 }
  0x3a   :  { %397 = vmatmul.mubr.msk.f32.vlgmr.msra.gmra.mrb[0].mxu0 %vm75_vm1, %v66_v3  ;;  %493 = vmatprep.subr.bf16.mxu0 %v627_v1  ;;  %v476_v12 = vpack.c.bf16 %v155_v11, %v154_v10  ;;  %v157_v14 = vld [vmem:[#allocation5 + $0x38] sm:$0xff]  ;;  %v158_v16 = vld [vmem:[#allocation5 + $0x40] sm:$0xff]  ;;  %v159_v17 = vld [vmem:[#allocation5 + $0x48] sm:$0xff]  ;;  %p593_p10 = scmp.ne.s32.totalorder %s345_s20, %s592_s21  ;;  %p598_p12 = scmp.lt.s32.totalorder %s592_s21, %s592_s21 }
  0x3b   :  { %466 = vmatprep.mubr.msk.f32.mxu0 %vm626_vm0, %v625_v0  ;;  %471 = vmatpush3.bf16.msra.mxu1 %v470_v8  ;;  %v479_v15 = vpack.c.bf16 %v157_v14, %v156_v13  ;;  %v482_v18 = vpack.c.bf16 %v159_v17, %v158_v16  ;;  %v160_v19 = vld [vmem:[#allocation5 + $0x50] sm:$0xff]  ;;  %v161_v20 = vld [vmem:[#allocation5 + $0x58] sm:$0xff]  ;;  %v162_v22 = vld [vmem:[#allocation5 + $0x60] sm:$0xff] }
  0x3c   :  { %472 = vmatprep.subr.bf16.mxu1 %v627_v1  ;;  %v485_v21 = vpack.c.bf16 %v161_v20, %v160_v19  ;;  %v163_v23 = vld [vmem:[#allocation5 + $0x68] sm:$0xff]  ;;  %v164_v25 = vld [vmem:[#allocation5 + $0x70] sm:$0xff]  ;;  %v165_v26 = vld [vmem:[#allocation5 + $0x78] sm:$0xff]  ;;  %p599_p13 = por %p598_p12, %p597_p11 }
  0x3d   :  { %v488_v24 = vpack.c.bf16 %v163_v23, %v162_v22  ;;  %v491_v27 = vpack.c.bf16 %v165_v26, %v164_v25  ;;  %v244_v28 = vld [vmem:[#allocation7] sm:$0xff]  ;;  %v245_v29 = vld [vmem:[#allocation7 + $0x8] sm:$0xff]  ;;  %v246_v30 = vld [vmem:[#allocation7 + $0x10] sm:$0xff] }
  0x3e   :  { %v494_v31 = vpack.c.bf16 %v245_v29, %v244_v28  ;;  %v247_v32 = vld [vmem:[#allocation7 + $0x18] sm:$0xff]  ;;  %v248_v34 = vld [vmem:[#allocation7 + $0x20] sm:$0xff]  ;;  %v249_v35 = vld [vmem:[#allocation7 + $0x28] sm:$0xff]  ;;  %p600_p0 = pnand %p599_p13, %p593_p10 }
  0x3f   :  { %474 = vmatpush3.bf16.msra.mxu1 %v473_v9  ;;  %v497_v33 = vpack.c.bf16 %v247_v32, %v246_v30  ;;  %v500_v36 = vpack.c.bf16 %v249_v35, %v248_v34  ;;  %v250_v37 = vld [vmem:[#allocation7 + $0x30] sm:$0xff]  ;;  %v251_v38 = vld [vmem:[#allocation7 + $0x38] sm:$0xff]  ;;  %v252_v40 = vld [vmem:[#allocation7 + $0x40] sm:$0xff] }
  0x40   :  { %475 = vmatprep.subr.bf16.mxu1 %v627_v1  ;;  %495 = vmatpush3.bf16.msra.mxu0 %v494_v31  ;;  %v503_v39 = vpack.c.bf16 %v251_v38, %v250_v37  ;;  %v253_v41 = vld [vmem:[#allocation7 + $0x48] sm:$0xff]  ;;  %v254_v43 = vld [vmem:[#allocation7 + $0x50] sm:$0xff]  ;;  %v255_v44 = vld [vmem:[#allocation7 + $0x58] sm:$0xff] }
  0x41   :  { %496 = vmatprep.subr.bf16.mxu0 %v627_v1  ;;  %v506_v42 = vpack.c.bf16 %v253_v41, %v252_v40  ;;  %v509_v45 = vpack.c.bf16 %v255_v44, %v254_v43  ;;  %v256_v46 = vld [vmem:[#allocation7 + $0x60] sm:$0xff]  ;;  %v257_v47 = vld [vmem:[#allocation7 + $0x68] sm:$0xff]  ;;  %v354_v49 = vld [vmem:[%s756_s2] ss:$0 sm:$0xff] }
  0x42   :  { %v512_v48 = vpack.c.bf16 %v257_v47, %v256_v46  ;;  %v258_v54 = vld [vmem:[#allocation7 + $0x70] sm:$0xff]  ;;  %v259_v55 = vld [vmem:[#allocation7 + $0x78] sm:$0xff] }
  0x43   :  { %477 = vmatpush3.bf16.msra.mxu1 %v476_v12  ;;  %v515_v56 = vpack.c.bf16 %v259_v55, %v258_v54  ;;  %v356_v57 = vld [vmem:[%s758_s4] ss:$0 sm:$0xff] }
  0x44   :  { %478 = vmatprep.subr.bf16.mxu1 %v627_v1  ;;  %498 = vmatpush3.bf16.msra.mxu0 %v497_v33  ;;  %v357_v62 = vld [vmem:[%s760_s6] ss:$0 sm:$0xff] }
  0x45   :  { %499 = vmatprep.subr.bf16.mxu0 %v627_v1 }
  0x47   :  { %480 = vmatpush3.bf16.msra.mxu1 %v479_v15 }
  0x48   :  { %481 = vmatprep.subr.bf16.mxu1 %v627_v1  ;;  %501 = vmatpush3.bf16.msra.mxu0 %v500_v36 }
  0x49   :  { %502 = vmatprep.subr.bf16.mxu0 %v627_v1 }
  0x4b   :  { %483 = vmatpush3.bf16.msra.mxu1 %v482_v18 }
  0x4c   :  { %484 = vmatprep.subr.bf16.mxu1 %v627_v1  ;;  %504 = vmatpush3.bf16.msra.mxu0 %v503_v39 }
  0x4d   :  { %505 = vmatprep.subr.bf16.mxu0 %v627_v1 }
  0x4f   :  { %486 = vmatpush3.bf16.msra.mxu1 %v485_v21 }
  0x50   :  { %487 = vmatprep.subr.bf16.mxu1 %v627_v1  ;;  %507 = vmatpush3.bf16.msra.mxu0 %v506_v42 }
  0x51   :  { %508 = vmatprep.subr.bf16.mxu0 %v627_v1 }
  0x53   :  { %489 = vmatpush3.bf16.msra.mxu1 %v488_v24 }
  0x54   :  { %490 = vmatprep.subr.bf16.mxu1 %v627_v1  ;;  %510 = vmatpush3.bf16.msra.mxu0 %v509_v45 }
  0x55   :  { %511 = vmatprep.subr.bf16.mxu0 %v627_v1 }
  0x57   :  { %492 = vmatpush3.bf16.msra.mxu1 %v491_v27 }
  0x58   :  { %513 = vmatpush3.bf16.msra.mxu0 %v512_v48 }
  0x59   :  { %514 = vmatprep.subr.bf16.mxu0 %v627_v1 }
  0x5c   :  { %516 = vmatpush3.bf16.msra.mxu0 %v515_v56 }
 0x10d   :  { %v145_v50 = vpop.f32.mrb[0].mxu0 }
 0x10e   :  { %v146_v51 = vadd.f32 %v354_v49, %v145_v50  ;;  %v398_v52 = vpop.f32.mrb[1].mxu0 }
 0x110   :  { %v149_v53 = vmax.f32 %v146_v51, 0.0 }
 0x112   :  { %432 = vmatmul.mubr.f32.vlgmr.msra.gmra.mrb[0].mxu1 %v149_v53 }
 0x1e5   :  { %v239_v58 = vpop.f32.mrb[0].mxu1 }
 0x1e6   :  { %v240_v59 = vadd.f32 %v356_v57, %v239_v58  ;;  %v433_v60 = vpop.f32.mrb[1].mxu1 }
 0x1e8   :  { %v243_v61 = vmax.f32 %v240_v59, 0.0 }
 0x1ea   :  { %467 = vmatmul.mubr.f32.vlgmr.msra.gmra.mrb[2].mxu0 %v243_v61 }
 0x2bd   :  { %v333_v63 = vpop.f32.mrb[2].mxu0 }
 0x2be   :  { %v334_v0 = vadd.f32 %v357_v62, %v333_v63  ;;  %v468_v1 = vpop.f32.mrb[3].mxu0 }
 0x2c0   :  { %337 = vst [vmem:[#allocation8] sm:$0x3] %v334_v0 }
 0x2c1   :  { %603 = shalt.err (!%p600_p0)
}
 0x2c2   :  { %s604_s23 = scalar_lea.hbm %s761_s7, 32 }
 0x2c3   :  { %p605_p1 = scmp.ne.s32.totalorder %s761_s7, %s604_s23  ;;  %p608_p2 = scmp.lt.u32.totalorder %s604_s23, %s761_s7 }
 0x2c5   :  { %p610_p3 = pnand %p608_p2, %p605_p1 }
 0x2c7   :  { %613 = shalt.err (!%p610_p3)
}
 0x2c8   :  { %347 = dma.vmem_to_hbm [thread:$0]  %s345_s20, 32, %s761_s7, [#allocation4]  }
 0x2c9   :  { %618 = dma.done.wait [#allocation4], 32  }
 0x2ca   :  { %619 = vsyncadd [#allocation4], 4294967264 }
 0x2cb   :  { %351 = vsyncpa [#allocation3], 1 }
 0x2cc   :  { %352 = vsyncpa [#allocation6], 1 }
 0x2cd   :  { %353 = vsyncpa [#allocation4], 1 }

</bundles_post_ra>
